<compile_context>
chip_gen: v7x
topology: tpu7x:2x2x1
jax: 0.10.0
libtpu: 0.0.40
codegen_flags: <defaults>
</compile_context>

<pallas_src>
import functools

import jax
import jax.numpy as jnp
from jax.experimental import pallas as pl
from jax.experimental.pallas import tpu as pltpu


# ----------------------------- parameters ----------------------------------

def get_output_size(task):
    if task == 'all':
        return 2
    elif task == 'sum':
        return 3
    elif task in ['blue', 'yellow', 'or']:
        return 1
    else:
        raise ValueError(f"Task '{task}' is not recognized.")


def xavier_uniform(key, shape, fan_in, fan_out, dtype=jnp.float32):
    bound = (6.0 / (fan_in + fan_out)) ** 0.5
    return jax.random.uniform(key, shape, dtype, minval=-bound, maxval=bound)


def init_temporal_conv_params(key, task, emb_size, filters, kernel_size):
    out_size = get_output_size(task)
    k_conv, k_l1, k_l2 = jax.random.split(key, 3)

    # PyTorch Conv1d weight: (filters, emb, K)
    w_conv_pt = xavier_uniform(
        k_conv, (filters, emb_size, kernel_size),
        fan_in=emb_size * kernel_size, fan_out=filters * kernel_size)
    b_conv = jnp.zeros((filters,), jnp.float32)

    hid = filters // 4
    w1_pt = xavier_uniform(k_l1, (hid, filters), fan_in=filters, fan_out=hid)
    b1 = jnp.zeros((hid,), jnp.float32)
    w2_pt = xavier_uniform(k_l2, (out_size, hid), fan_in=hid, fan_out=out_size)
    b2 = jnp.zeros((out_size,), jnp.float32)

    params = {
        "w_conv": jnp.transpose(w_conv_pt, (2, 1, 0)),   # (K, C, F)
        "b_conv": b_conv.reshape(1, filters),            # (1, F)
        "w1": jnp.transpose(w1_pt, (1, 0)),              # (F, H)
        "b1": b1.reshape(1, hid),                        # (1, H)
        "w2": jnp.transpose(w2_pt, (1, 0)),              # (H, O)
        "b2": b2.reshape(1, out_size),                   # (1, O)
    }
    return params, out_size


# ------------------------------- kernel -------------------------------------

def temporal_conv_kernel(x_ref, wconv_ref, bconv_ref, w1_ref, b1_ref,
                         w2_ref, b2_ref, out_ref, *, valid_len):
    # x_ref:     (BB*L_pad, KC_pad) bf16/f32 im2col rows of this batch block
    # wconv_ref: (KC_pad, F)        flattened conv weight, bconv_ref: (1, F) f32
    # w1_ref:(F,H) b1_ref:(1,H)  w2_ref:(H,O)  b2_ref:(1,O)  (all f32)
    # out_ref:   (BB, O)
    bb = out_ref.shape[0]
    m_blk = x_ref.shape[0]
    l_pad = m_blk // bb
    f = wconv_ref.shape[1]

    # Conv1d (valid, padding=0) over all BB*L_pad rows: a single accumulated
    # MXU matmul with contraction depth KC_pad (im2col'd on the host).
    acc = jnp.dot(x_ref[...], wconv_ref[...],
                  preferred_element_type=jnp.float32)            # (m_blk, F) f32
    r = jnp.maximum(acc + bconv_ref[...], 0.0)

    # AdaptiveAvgPool1d(1): dense sublane reduce over the L valid positions of
    # each batch group. The reshape is a pure view (l_pad % 8 == 0, F lanes);
    # padded positions [valid_len, l_pad) are never read.
    r = r.reshape(bb, l_pad, f)
    pooled = jnp.sum(r[:, :valid_len, :], axis=1) * (1.0 / valid_len)  # (BB, F)

    # Batched MLP head: Linear -> ReLU -> Linear (tiny; kept in f32).
    h = jnp.maximum(
        jnp.dot(pooled, w1_ref[...], preferred_element_type=jnp.float32)
        + b1_ref[...], 0.0)
    out = jnp.dot(h, w2_ref[...], preferred_element_type=jnp.float32) + b2_ref[...]
    out_ref[...] = out.astype(out_ref.dtype)


# ------------------------------- wrapper -------------------------------------

def _round_up(n, m):
    return ((n + m - 1) // m) * m


def temporal_conv_forward(x, params, kernel_size, *, block_batch_cap=128,
                          conv_dtype=jnp.bfloat16,
                          vmem_budget_bytes=20 * 1024 * 1024):
    """x: (B, T, C) float32  ->  (B, output_size) float32."""
    B, T, C = x.shape
    K, Cw, F = params["w_conv"].shape
    H = params["w1"].shape[1]
    O = params["w2"].shape[1]
    assert K == kernel_size and Cw == C
    assert T >= K, "sequence shorter than kernel_size"

    L = T - K + 1                        # valid conv output length
    L_pad = _round_up(L, 8)
    KC = K * C
    KC_pad = _round_up(KC, 128)          # lane-dense im2col rows
    x_item = jnp.dtype(conv_dtype).itemsize

    # --- block-batch size from VMEM footprint (v7x-safe) --------------------
    #   per flat row: x block double-buffered + ~3 f32 temporaries of width F
    bytes_per_row = 2 * KC_pad * x_item + 3 * F * 4
    BB = min(block_batch_cap,
             max(8, vmem_budget_bytes // (L_pad * bytes_per_row)))
    BB = max(8, (BB // 8) * 8)
    # v7x has 2 TensorCores: prefer >= 2 parallel grid steps when batch allows.
    while BB > 8 and _round_up(B, BB) // BB < 2:
        BB = max(8, ((BB // 2) // 8) * 8)
    B_pad = _round_up(B, BB)

    # --- host-side im2col (k-major concat of shifted time slices) -----------
    # Layout plumbing only; padded batch/time/lane entries are zeros and the
    # kernel never pools the padded time positions.
    xf = x.astype(jnp.float32)
    cols = jnp.concatenate([xf[:, k:k + L, :] for k in range(K)],
                           axis=-1)                                   # (B, L, K*C)
    cols = jnp.pad(cols, ((0, B_pad - B), (0, L_pad - L), (0, KC_pad - KC)))
    x_flat = cols.reshape(B_pad * L_pad, KC_pad).astype(conv_dtype)

    w_flat = jnp.pad(params["w_conv"].reshape(KC, F),
                     ((0, KC_pad - KC), (0, 0))).astype(conv_dtype)   # (KC_pad, F)

    m_blk = BB * L_pad
    grid = (B_pad // BB,)

    vmem_est = (2 * m_blk * KC_pad * x_item        # x block (double-buffered)
                + 3 * m_blk * F * 4                # conv acc / relu temporaries
                + KC_pad * F * x_item + F * 4      # conv weight + bias
                + F * H * 4 + H * 4 + H * O * 4 + O * 4
                + 2 * BB * O * 4)                  # out block (double-buffered)
    vmem_limit = int(min(32 * 1024 * 1024, max(8 * 1024 * 1024, 2 * vmem_est)))

    out = pl.pallas_call(
        functools.partial(temporal_conv_kernel, valid_len=L),
        out_shape=jax.ShapeDtypeStruct((B_pad, O), jnp.float32),
        grid_spec=pltpu.PrefetchScalarGridSpec(
            num_scalar_prefetch=0,
            grid=grid,
            in_specs=[
                pl.BlockSpec((m_blk, KC_pad), lambda i: (i, 0)),   # im2col rows
                pl.BlockSpec((KC_pad, F), lambda i: (0, 0)),       # conv weight
                pl.BlockSpec((1, F), lambda i: (0, 0)),            # conv bias
                pl.BlockSpec((F, H), lambda i: (0, 0)),            # w1
                pl.BlockSpec((1, H), lambda i: (0, 0)),            # b1
                pl.BlockSpec((H, O), lambda i: (0, 0)),            # w2
                pl.BlockSpec((1, O), lambda i: (0, 0)),            # b2
            ],
            out_specs=pl.BlockSpec((BB, O), lambda i: (i, 0)),
        ),
        compiler_params=pltpu.CompilerParams(
            dimension_semantics=("parallel",),
            vmem_limit_bytes=vmem_limit,
        ),
    )(x_flat, w_flat, params["b_conv"], params["w1"],
      params["b1"], params["w2"], params["b2"])
    return out[:B]


# ------------------------------ reference -----------------------------------

def temporal_conv_ref(x, params, kernel_size):
    B, T, C = x.shape
    K, _, F = params["w_conv"].shape
    L = T - K + 1
    y = jnp.zeros((B, L, F), jnp.float32)
    for k in range(K):
        y = y + jnp.einsum("btc,cf->btf", x[:, k:k + L, :], params["w_conv"][k])
    y = jnp.maximum(y + params["b_conv"][None], 0.0)
    pooled = jnp.mean(y, axis=1)                                   # (B, F)
    h = jnp.maximum(pooled @ params["w1"] + params["b1"], 0.0)
    return h @ params["w2"] + params["b2"]


# -------------------------------- main ---------------------------------------

if __name__ == "__main__":
    task = "sum"            # output_size = 3
    B, T, emb_size = 2, 8, 32
    filters, kernel_size = 128, 3

    key = jax.random.PRNGKey(0)
    k_params, k_x = jax.random.split(key)
    params, out_size = init_temporal_conv_params(
        k_params, task, emb_size, filters, kernel_size)

    x = jax.random.normal(k_x, (B, T, emb_size), jnp.float32)

    out = temporal_conv_forward(x, params, kernel_size)
    out = jax.block_until_ready(out)
    assert out.shape == (B, out_size), out.shape

    # Tight check: reference computed on the same bf16-quantized conv operands
    # (isolates kernel logic from bf16 input quantization).
    x_q = x.astype(jnp.bfloat16).astype(jnp.float32)
    params_q = dict(params)
    params_q["w_conv"] = params["w_conv"].astype(jnp.bfloat16).astype(jnp.float32)
    ref_q = temporal_conv_ref(x_q, params_q, kernel_size)
    assert jnp.allclose(out, ref_q, atol=1e-3, rtol=1e-3), (out, ref_q)

    # Loose check against the pure-f32 reference (bf16 MXU inputs, f32 accum).
    ref = temporal_conv_ref(x, params, kernel_size)
    assert jnp.allclose(out, ref, atol=3e-2, rtol=3e-2), (out, ref)

    print("KERNEL_OK")
</pallas_src>

<mosaic_0001>
module attributes {stable_mosaic.version = 11 : i64} {
  func.func @temporal_conv_kernel(%arg0: i32, %arg1: memref<64x128xbf16, #tpu.memory_space<vmem>>, %arg2: memref<128x128xbf16, #tpu.memory_space<vmem>>, %arg3: memref<1x128xf32, #tpu.memory_space<vmem>>, %arg4: memref<128x32xf32, #tpu.memory_space<vmem>>, %arg5: memref<1x32xf32, #tpu.memory_space<vmem>>, %arg6: memref<32x3xf32, #tpu.memory_space<vmem>>, %arg7: memref<1x3xf32, #tpu.memory_space<vmem>>, %arg8: memref<8x3xf32, #tpu.memory_space<vmem>>) attributes {dimension_semantics = [#tpu.dimension_semantics<parallel>], iteration_bounds = array<i64: 1>, scalar_prefetch = 0 : i64, scratch_operands = 0 : i64, tpu.core_type = #tpu.core_type<tc>, window_params = [{transform_indices = @transform_0, window_bounds = array<i64: 64, 128>}, {pipeline_mode = #tpu.pipeline_mode<synchronous>, transform_indices = @transform_1, window_bounds = array<i64: 128, 128>}, {pipeline_mode = #tpu.pipeline_mode<synchronous>, transform_indices = @transform_2, window_bounds = array<i64: 1, 128>}, {pipeline_mode = #tpu.pipeline_mode<synchronous>, transform_indices = @transform_3, window_bounds = array<i64: 128, 32>}, {pipeline_mode = #tpu.pipeline_mode<synchronous>, transform_indices = @transform_4, window_bounds = array<i64: 1, 32>}, {pipeline_mode = #tpu.pipeline_mode<synchronous>, transform_indices = @transform_5, window_bounds = array<i64: 32, 3>}, {pipeline_mode = #tpu.pipeline_mode<synchronous>, transform_indices = @transform_6, window_bounds = array<i64: 1, 3>}, {transform_indices = @transform_7, window_bounds = array<i64: 8, 3>}]} {
    %c0 = arith.constant 0 : index
    %c0_0 = arith.constant 0 : index
    %0 = vector.load %arg1[%c0, %c0_0] : memref<64x128xbf16, #tpu.memory_space<vmem>>, vector<64x128xbf16>
    %c0_1 = arith.constant 0 : index
    %c0_2 = arith.constant 0 : index
    %1 = vector.load %arg2[%c0_1, %c0_2] : memref<128x128xbf16, #tpu.memory_space<vmem>>, vector<128x128xbf16>
    %cst = arith.constant dense<0.000000e+00> : vector<64x128xf32>
    %2 = tpu.matmul %0, %1, %cst {dimension_numbers = #tpu.dot_dimension_numbers<[1], [0], [0], [1], [0, 0, 1, 1], [], []>} : vector<64x128xbf16>, vector<128x128xbf16>, vector<64x128xf32> -> vector<64x128xf32>
    %c0_3 = arith.constant 0 : index
    %c0_4 = arith.constant 0 : index
    %3 = vector.load %arg3[%c0_3, %c0_4] : memref<1x128xf32, #tpu.memory_space<vmem>>, vector<1x128xf32>
    %4 = vector.broadcast %3 : vector<1x128xf32> to vector<64x128xf32>
    %5 = arith.addf %2, %4 : vector<64x128xf32>
    %cst_5 = arith.constant 0.000000e+00 : f32
    %6 = vector.broadcast %cst_5 : f32 to vector<64x128xf32>
    %7 = arith.maximumf %5, %6 : vector<64x128xf32>
    %8 = vector.shape_cast %7 : vector<64x128xf32> to vector<8x8x128xf32>
    %9 = vector.extract_strided_slice %8 {offsets = [0, 0, 0], sizes = [8, 6, 128], strides = [1, 1, 1]} : vector<8x8x128xf32> to vector<8x6x128xf32>
    %cst_6 = arith.constant dense<0.000000e+00> : vector<8x128xf32>
    %10 = vector.multi_reduction <add>, %9, %cst_6 [1] : vector<8x6x128xf32> to vector<8x128xf32>
    %cst_7 = arith.constant 0.166666672 : f32
    %11 = vector.broadcast %cst_7 : f32 to vector<8x128xf32>
    %12 = arith.mulf %10, %11 : vector<8x128xf32>
    %c0_8 = arith.constant 0 : index
    %c0_9 = arith.constant 0 : index
    %13 = vector.load %arg4[%c0_8, %c0_9] : memref<128x32xf32, #tpu.memory_space<vmem>>, vector<128x32xf32>
    %cst_10 = arith.constant dense<0.000000e+00> : vector<8x32xf32>
    %14 = tpu.matmul %12, %13, %cst_10 {dimension_numbers = #tpu.dot_dimension_numbers<[1], [0], [0], [1], [0, 0, 1, 1], [], []>} : vector<8x128xf32>, vector<128x32xf32>, vector<8x32xf32> -> vector<8x32xf32>
    %c0_11 = arith.constant 0 : index
    %c0_12 = arith.constant 0 : index
    %15 = vector.load %arg5[%c0_11, %c0_12] : memref<1x32xf32, #tpu.memory_space<vmem>>, vector<1x32xf32>
    %16 = vector.broadcast %15 : vector<1x32xf32> to vector<8x32xf32>
    %17 = arith.addf %14, %16 : vector<8x32xf32>
    %cst_13 = arith.constant 0.000000e+00 : f32
    %18 = vector.broadcast %cst_13 : f32 to vector<8x32xf32>
    %19 = arith.maximumf %17, %18 : vector<8x32xf32>
    %c0_14 = arith.constant 0 : index
    %c0_15 = arith.constant 0 : index
    %20 = vector.load %arg6[%c0_14, %c0_15] : memref<32x3xf32, #tpu.memory_space<vmem>>, vector<32x3xf32>
    %cst_16 = arith.constant dense<0.000000e+00> : vector<8x3xf32>
    %21 = tpu.matmul %19, %20, %cst_16 {dimension_numbers = #tpu.dot_dimension_numbers<[1], [0], [0], [1], [0, 0, 1, 1], [], []>} : vector<8x32xf32>, vector<32x3xf32>, vector<8x3xf32> -> vector<8x3xf32>
    %c0_17 = arith.constant 0 : index
    %c0_18 = arith.constant 0 : index
    %22 = vector.load %arg7[%c0_17, %c0_18] : memref<1x3xf32, #tpu.memory_space<vmem>>, vector<1x3xf32>
    %23 = vector.broadcast %22 : vector<1x3xf32> to vector<8x3xf32>
    %24 = arith.addf %21, %23 : vector<8x3xf32>
    %c0_19 = arith.constant 0 : index
    %c0_20 = arith.constant 0 : index
    %25 = vector.load %arg8[%c0_19, %c0_20] : memref<8x3xf32, #tpu.memory_space<vmem>>, vector<8x3xf32>
    tpu.vector_store %arg8[%c0_19, %c0_20], %24 {strides = array<i32>} : memref<8x3xf32, #tpu.memory_space<vmem>>, vector<8x3xf32>,
    return
  }
  func.func @transform_0(%arg0: i32) -> (i32, i32) {
    %c0_i32 = arith.constant 0 : i32
    %c0_i32_0 = arith.constant 0 : i32
    return %arg0, %c0_i32 : i32, i32
  }
  func.func @transform_1(%arg0: i32) -> (i32, i32) {
    %c0_i32 = arith.constant 0 : i32
    %c0_i32_0 = arith.constant 0 : i32
    %c0_i32_1 = arith.constant 0 : i32
    return %c0_i32, %c0_i32_0 : i32, i32
  }
  func.func @transform_2(%arg0: i32) -> (i32, i32) {
    %c0_i32 = arith.constant 0 : i32
    %c0_i32_0 = arith.constant 0 : i32
    %c0_i32_1 = arith.constant 0 : i32
    return %c0_i32, %c0_i32_0 : i32, i32
  }
  func.func @transform_3(%arg0: i32) -> (i32, i32) {
    %c0_i32 = arith.constant 0 : i32
    %c0_i32_0 = arith.constant 0 : i32
    %c0_i32_1 = arith.constant 0 : i32
    return %c0_i32, %c0_i32_0 : i32, i32
  }
  func.func @transform_4(%arg0: i32) -> (i32, i32) {
    %c0_i32 = arith.constant 0 : i32
    %c0_i32_0 = arith.constant 0 : i32
    %c0_i32_1 = arith.constant 0 : i32
    return %c0_i32, %c0_i32_0 : i32, i32
  }
  func.func @transform_5(%arg0: i32) -> (i32, i32) {
    %c0_i32 = arith.constant 0 : i32
    %c0_i32_0 = arith.constant 0 : i32
    %c0_i32_1 = arith.constant 0 : i32
    return %c0_i32, %c0_i32_0 : i32, i32
  }
  func.func @transform_6(%arg0: i32) -> (i32, i32) {
    %c0_i32 = arith.constant 0 : i32
    %c0_i32_0 = arith.constant 0 : i32
    %c0_i32_1 = arith.constant 0 : i32
    return %c0_i32, %c0_i32_0 : i32, i32
  }
  func.func @transform_7(%arg0: i32) -> (i32, i32) {
    %c0_i32 = arith.constant 0 : i32
    %c0_i32_0 = arith.constant 0 : i32
    return %arg0, %c0_i32 : i32, i32
  }
}

</mosaic_0001>

<bundles_post_ra>
// kernel: tpu_custom_call.1
= control target key start
LH: loop header
LB: loop body
LE: loop exit
PB: predicated region body
PF: predicated region fallthrough
CT: control target
= control target key end

     0   :  { %v641_v15 = vmov 0.0|0.0   ;;  %vm642_vm0 = vmmov 0   ;;  %v643_v37 = vmov 0.0   ;;  %vm203_vm1 = vcmask 1045504   ;;  %s814_s1 = inlined_call_operand.vmem [shape: bf16[128,128], index: 1, kind: input, shape index: {}]   ;;  %s815_s0 = inlined_call_operand.vmem [shape: bf16[64,128], index: 0, kind: input, shape index: {}]   ;;  %s816_s3 = inlined_call_operand.vmem [shape: f32[128,32], index: 3, kind: input, shape index: {}]   ;;  %s817_s2 = inlined_call_operand.vmem [shape: f32[1,128], index: 2, kind: input, shape index: {}]   ;;  %s818_s5 = inlined_call_operand.vmem [shape: f32[32,3], index: 5, kind: input, shape index: {}]   ;;  %s819_s4 = inlined_call_operand.vmem [shape: f32[1,32], index: 4, kind: input, shape index: {}]   ;;  %s820_s6 = inlined_call_operand.vmem [shape: f32[1,3], index: 6, kind: input, shape index: {}]   ;;  %s821_s7 = inlined_call_operand.vmem [shape: f32[8,3], index: 7, kind: output, shape index: {}]  }
   0x1   :  { %v629_v0 = vld [vmem:[%s814_s1] sm:$0xff]   ;;  %v630_v1 = vld [vmem:[%s814_s1 + $0x8] sm:$0xff]   ;;  %v631_v2 = vld [vmem:[%s814_s1 + $0x10] sm:$0xff]   ;;  %596 = vmatprep.subr.bf16.mxu1 %v641_v15  ;;  %582 = vmatprep.mubr.msk.f32.mxu1 %vm642_vm0, %v643_v37  ;;  %vm299_vm2 = vcmask 1041409   ;;  %vm301_vm3 = vcmask 1042434   ;;  %vm303_vm4 = vcmask 1043459  }
   0x2   :  { %526 = vmatprep.subr.bf16.mxu0 %v629_v0  ;;  %v632_v3 = vld [vmem:[%s814_s1 + $0x18] sm:$0xff]   ;;  %v637_v4 = vld [vmem:[%s815_s0] sm:$0xff]   ;;  %v634_v6 = vld [vmem:[%s814_s1 + $0x28] sm:$0xff]   ;;  %vm305_vm5 = vcmask 1044484   ;;  %vm307_vm6 = vcmask 1045509   ;;  %vm309_vm7 = vcmask 1046534  }
   0x3   :  { %527 = vmatpush3.bf16.msra.mxu0 %v629_v0  ;;  %542 = vmatprep.mubr.bf16.mxu0 %v637_v4  ;;  %v633_v5 = vld [vmem:[%s814_s1 + $0x20] sm:$0xff]   ;;  %v635_v7 = vld [vmem:[%s814_s1 + $0x30] sm:$0xff]   ;;  %v636_v8 = vld [vmem:[%s814_s1 + $0x38] sm:$0xff]   ;;  %vm311_vm8 = vcmask 1047559   ;;  %vm396_vm9 = vcmask 261120   ;;  %vm470_vm10 = vcmask 23552  }
   0x4   :  { %528 = vmatprep.subr.bf16.mxu0 %v630_v1  ;;  %v638_v9 = vld [vmem:[%s815_s0 + $0x8] sm:$0xff]   ;;  %v639_v10 = vld [vmem:[%s815_s0 + $0x10] sm:$0xff]   ;;  %v640_v11 = vld [vmem:[%s815_s0 + $0x18] sm:$0xff]  }
   0x5   :  { %v268_v12 = vld [vmem:[%s816_s3] sm:$0xff]  ;;  %v269_v13 = vld [vmem:[%s816_s3 + $0x8] sm:$0xff]  ;;  %v270_v16 = vld [vmem:[%s816_s3 + $0x10] sm:$0xff] }
   0x6   :  { %v597_v14 = vpack.c.bf16 %v269_v13, %v268_v12  ;;  %v271_v17 = vld [vmem:[%s816_s3 + $0x18] sm:$0xff]  ;;  %v272_v19 = vld [vmem:[%s816_s3 + $0x20] sm:$0xff]  ;;  %v273_v20 = vld [vmem:[%s816_s3 + $0x28] sm:$0xff] }
   0x7   :  { %529 = vmatpush3.bf16.msra.mxu0 %v630_v1  ;;  %v600_v18 = vpack.c.bf16 %v271_v17, %v270_v16  ;;  %v603_v21 = vpack.c.bf16 %v273_v20, %v272_v19  ;;  %v274_v22 = vld [vmem:[%s816_s3 + $0x30] sm:$0xff]  ;;  %v275_v23 = vld [vmem:[%s816_s3 + $0x38] sm:$0xff]  ;;  %v276_v25 = vld [vmem:[%s816_s3 + $0x40] sm:$0xff] }
   0x8   :  { %530 = vmatprep.subr.bf16.mxu0 %v631_v2  ;;  %598 = vmatpush3.bf16.msra.mxu1 %v597_v14  ;;  %v606_v24 = vpack.c.bf16 %v275_v23, %v274_v22  ;;  %v277_v26 = vld [vmem:[%s816_s3 + $0x48] sm:$0xff]  ;;  %v278_v28 = vld [vmem:[%s816_s3 + $0x50] sm:$0xff]  ;;  %v279_v29 = vld [vmem:[%s816_s3 + $0x58] sm:$0xff] }
   0x9   :  { %599 = vmatprep.subr.bf16.mxu1 %v641_v15  ;;  %v609_v27 = vpack.c.bf16 %v277_v26, %v276_v25  ;;  %v612_v30 = vpack.c.bf16 %v279_v29, %v278_v28  ;;  %v280_v31 = vld [vmem:[%s816_s3 + $0x60] sm:$0xff]  ;;  %v281_v32 = vld [vmem:[%s816_s3 + $0x68] sm:$0xff]  ;;  %v282_v34 = vld [vmem:[%s816_s3 + $0x70] sm:$0xff] }
   0xa   :  { %v615_v33 = vpack.c.bf16 %v281_v32, %v280_v31  ;;  %v283_v35 = vld [vmem:[%s816_s3 + $0x78] sm:$0xff]  ;;  %v476_v38 = vld [vmem:[%s817_s2] ss:$0 sm:$0xff] }
   0xb   :  { %531 = vmatpush3.bf16.msra.mxu0 %v631_v2  ;;  %v618_v36 = vpack.c.bf16 %v283_v35, %v282_v34 }
   0xc   :  { %532 = vmatprep.subr.bf16.mxu0 %v632_v3  ;;  %601 = vmatpush3.bf16.msra.mxu1 %v600_v18 }
   0xd   :  { %602 = vmatprep.subr.bf16.mxu1 %v641_v15 }
   0xf   :  { %533 = vmatpush3.bf16.msra.mxu0 %v632_v3 }
  0x10   :  { %534 = vmatprep.subr.bf16.mxu0 %v633_v5  ;;  %604 = vmatpush3.bf16.msra.mxu1 %v603_v21 }
  0x11   :  { %605 = vmatprep.subr.bf16.mxu1 %v641_v15 }
  0x13   :  { %535 = vmatpush3.bf16.msra.mxu0 %v633_v5 }
  0x14   :  { %536 = vmatprep.subr.bf16.mxu0 %v634_v6  ;;  %607 = vmatpush3.bf16.msra.mxu1 %v606_v24 }
  0x15   :  { %608 = vmatprep.subr.bf16.mxu1 %v641_v15 }
  0x17   :  { %537 = vmatpush3.bf16.msra.mxu0 %v634_v6 }
  0x18   :  { %538 = vmatprep.subr.bf16.mxu0 %v635_v7  ;;  %610 = vmatpush3.bf16.msra.mxu1 %v609_v27 }
  0x19   :  { %611 = vmatprep.subr.bf16.mxu1 %v641_v15 }
  0x1b   :  { %539 = vmatpush3.bf16.msra.mxu0 %v635_v7 }
  0x1c   :  { %540 = vmatprep.subr.bf16.mxu0 %v636_v8  ;;  %613 = vmatpush3.bf16.msra.mxu1 %v612_v30 }
  0x1d   :  { %614 = vmatprep.subr.bf16.mxu1 %v641_v15 }
  0x1f   :  { %541 = vmatpush3.bf16.msra.mxu0 %v636_v8 }
  0x20   :  { %616 = vmatpush3.bf16.msra.mxu1 %v615_v33 }
  0x21   :  { %617 = vmatprep.subr.bf16.mxu1 %v641_v15 }
  0x22   :  { %543 = vmatmul.mubr.bf16.vlgmr.msra.gmra.mrb[0].mxu0 %v638_v9 }
  0x23   :  { %546 = vmatprep.mubr.bf16.mxu0 %v639_v10 }
  0x24   :  { %619 = vmatpush3.bf16.msra.mxu1 %v618_v36 }
  0x25   :  { %620 = vmatprep.subr.bf16.mxu1 %v641_v15 }
  0x2a   :  { %547 = vmatmul.mubr.bf16.gmra.mrb[4].mxu0 %v640_v11 }
  0xf5   :  { %v544_v39 = vpop.f32.mrb[0].mxu0 }
  0xf6   :  { %v173_v40 = vadd.f32 %v544_v39, %v476_v38  ;;  %v164_v41 = vpop.f32.mrb[1].mxu0 }
  0xf7   :  { %v165_v42 = vadd.f32 %v476_v38, %v164_v41  ;;  %v545_v43 = vpop.f32.mrb[2].mxu0 }
  0xf8   :  { %v197_v44 = vmax.f32 %v173_v40, 0.0  ;;  %v176_v45 = vadd.f32 %v545_v43, %v476_v38  ;;  %v167_v46 = vpop.f32.mrb[3].mxu0 }
  0xf9   :  { %v195_v47 = vmax.f32 %v165_v42, 0.0  ;;  %v168_v48 = vadd.f32 %v476_v38, %v167_v46 }
  0xfa   :  { %v218_v49 = vsel %vm203_vm1, %v197_v44, 0.0  ;;  %v198_v50 = vmax.f32 %v176_v45, 0.0 }
  0xfb   :  { %v219_v51 = vrot.slane %v218_v49, 4  ;;  %v204_v52 = vsel %vm203_vm1, %v195_v47, 0.0  ;;  %v196_v53 = vmax.f32 %v168_v48, 0.0 }
  0xfc   :  { %v205_v54 = vrot.slane %v204_v52, 4  ;;  %v225_v55 = vsel %vm203_vm1, %v198_v50, 0.0 }
  0xfd   :  { %v220_v56 = vadd.f32 %v219_v51, %v218_v49  ;;  %v226_v57 = vrot.slane %v225_v55, 4  ;;  %v211_v58 = vsel %vm203_vm1, %v196_v53, 0.0  ;;  %v548_v59 = vpop.f32.mrb[4].mxu0 }
  0xfe   :  { %v206_v60 = vadd.f32 %v205_v54, %v204_v52  ;;  %v212_v61 = vrot.slane %v211_v58, 4  ;;  %v189_v62 = vadd.f32 %v548_v59, %v476_v38  ;;  %v180_v63 = vpop.f32.mrb[5].mxu0 }
  0xff   :  { %v221_v0 = vrot.slane %v220_v56, 2  ;;  %v227_v1 = vadd.f32 %v226_v57, %v225_v55  ;;  %v181_v2 = vadd.f32 %v476_v38, %v180_v63  ;;  %v549_v3 = vpop.f32.mrb[6].mxu0 }
 0x100   :  { %v207_v4 = vrot.slane %v206_v60, 2  ;;  %v213_v5 = vadd.f32 %v212_v61, %v211_v58  ;;  %v201_v6 = vmax.f32 %v189_v62, 0.0  ;;  %v192_v7 = vadd.f32 %v549_v3, %v476_v38  ;;  %v183_v8 = vpop.f32.mrb[7].mxu0  ;;  %v386_v3 = vld [vmem:[%s818_s5 + $0x8] sm:$0xff] }
 0x101   :  { %v222_v9 = vadd.f32 %v221_v0, %v220_v56  ;;  %v228_v10 = vrot.slane %v227_v1, 2  ;;  %v199_v11 = vmax.f32 %v181_v2, 0.0  ;;  %v184_v12 = vadd.f32 %v476_v38, %v183_v8  ;;  %v385_v2 = vld [vmem:[%s818_s5] sm:$0xff] }
 0x102   :  { %v208_v13 = vadd.f32 %v207_v4, %v206_v60  ;;  %v214_v14 = vrot.slane %v213_v5, 2  ;;  %v246_v16 = vsel %vm203_vm1, %v201_v6, 0.0  ;;  %v202_v17 = vmax.f32 %v192_v7, 0.0 }
 0x103   :  { %v223_v18 = vrot.slane %v222_v9, 1  ;;  %v229_v19 = vadd.f32 %v228_v10, %v227_v1  ;;  %v247_v20 = vrot.slane %v246_v16, 4  ;;  %v232_v21 = vsel %vm203_vm1, %v199_v11, 0.0  ;;  %v387_v11 = vld [vmem:[%s818_s5 + $0x10] sm:$0xff] }
 0x104   :  { %v209_v22 = vrot.slane %v208_v13, 1  ;;  %v215_v23 = vadd.f32 %v214_v14, %v213_v5  ;;  %v233_v24 = vrot.slane %v232_v21, 4  ;;  %v253_v25 = vsel %vm203_vm1, %v202_v17, 0.0  ;;  %v489_v14 = vld [vmem:[%s819_s4] ss:$0 sm:$0xff] }
 0x105   :  { %v230_v26 = vrot.slane %v229_v19, 1  ;;  %v248_v27 = vadd.f32 %v247_v20, %v246_v16  ;;  %v254_v28 = vrot.slane %v253_v25, 4  ;;  %v200_v32 = vmax.f32 %v184_v12, 0.0  ;;  %v388_v12 = vld [vmem:[%s818_s5 + $0x18] sm:$0xff] }
 0x106   :  { %v210_v29 = vadd.f32 %v209_v22, %v208_v13  ;;  %v216_v30 = vrot.slane %v215_v23, 1  ;;  %v234_v31 = vadd.f32 %v233_v24, %v232_v21  ;;  %v224_v33 = vadd.f32 %v223_v18, %v222_v9 }
 0x107   :  { %v249_v34 = vrot.slane %v248_v27, 2  ;;  %v255_v35 = vadd.f32 %v254_v28, %v253_v25  ;;  %v231_v36 = vadd.f32 %v230_v26, %v229_v19  ;;  %v239_v40 = vsel %vm203_vm1, %v200_v32, 0.0 }
 0x108   :  { %v217_v38 = vadd.f32 %v216_v30, %v215_v23  ;;  %v235_v39 = vrot.slane %v234_v31, 2  ;;  %v240_v42 = vrot.slane %v239_v40, 4  ;;  %v260_v43 = vmul.f32 0.16666667, %v210_v29 }
 0x109   :  { %v256_v41 = vrot.slane %v255_v35, 2  ;;  %v250_v45 = vadd.f32 %v249_v34, %v248_v27  ;;  %v262_v47 = vmul.f32 0.16666667, %v224_v33  ;;  %v263_v50 = vmul.f32 0.16666667, %v231_v36 }
 0x10a   :  { %v261_v44 = vmul.f32 0.16666667, %v217_v38  ;;  %v236_v46 = vadd.f32 %v235_v39, %v234_v31  ;;  %v241_v49 = vadd.f32 %v240_v42, %v239_v40  ;;  %v621_v8 = vpack.c.bf16 %v386_v3, %v385_v2 }
 0x10b   :  { %v257_v48 = vadd.f32 %v256_v41, %v255_v35  ;;  %v251_v55 = vrot.slane %v250_v45, 1  ;;  %v624_v13 = vpack.c.bf16 %v388_v12, %v387_v11 }
 0x10c   :  { %v300_v51 = vsel %vm299_vm2, %v261_v44, %v260_v43  ;;  %v237_v52 = vrot.slane %v236_v46, 1  ;;  %v242_v53 = vrot.slane %v241_v49, 2 }
 0x10d   :  { %v302_v54 = vsel %vm301_vm3, %v262_v47, %v300_v51  ;;  %v258_v58 = vrot.slane %v257_v48, 1  ;;  %v252_v62 = vadd.f32 %v251_v55, %v250_v45 }
 0x10e   :  { %v238_v56 = vadd.f32 %v237_v52, %v236_v46  ;;  %v304_v57 = vsel %vm303_vm4, %v263_v50, %v302_v54  ;;  %v243_v59 = vadd.f32 %v242_v53, %v241_v49 }
 0x10f   :  { %v259_v1 = vadd.f32 %v258_v58, %v257_v48  ;;  %v266_v5 = vmul.f32 0.16666667, %v252_v62 }
 0x110   :  { %v264_v60 = vmul.f32 0.16666667, %v238_v56  ;;  %v244_v61 = vrot.slane %v243_v59, 1 }
 0x111   :  { %v267_v6 = vmul.f32 0.16666667, %v259_v1 }
 0x112   :  { %v306_v63 = vsel %vm305_vm5, %v264_v60, %v304_v57  ;;  %v245_v0 = vadd.f32 %v244_v61, %v243_v59 }
 0x114   :  { %v265_v4 = vmul.f32 0.16666667, %v245_v0 }
 0x116   :  { %v308_v7 = vsel %vm307_vm6, %v265_v4, %v306_v63 }
 0x117   :  { %v310_v9 = vsel %vm309_vm7, %v266_v5, %v308_v7 }
 0x118   :  { %v312_v10 = vsel %vm311_vm8, %v267_v6, %v310_v9 }
 0x119   :  { %583 = vmatmul.mubr.f32.vlgmr.msra.gmra.mrb[0].mxu1 %v312_v10 }
 0x11a   :  { %622 = vmatpush3.bf16.msra.mxu1 %v621_v8  ;;  %593 = vmatprep.mubr.msk.f32.mxu1 %vm642_vm0, %v643_v37 }
 0x11b   :  { %623 = vmatprep.subr.bf16.mxu1 %v641_v15  ;;  %v490_v15 = vld [vmem:[%s820_s6] ss:$0 sm:$0xff] }
 0x11e   :  { %625 = vmatpush3.bf16.msra.mxu1 %v624_v13 }
 0x1ec   :  { %v380_v16 = vpop.f32.mrb[0].mxu1 }
 0x1ed   :  { %v381_v17 = vadd.f32 %v489_v14, %v380_v16  ;;  %v584_v18 = vpop.f32.mrb[1].mxu1 }
 0x1ef   :  { %v384_v37 = vmax.f32 %v381_v17, 0.0 }
 0x1f1   :  { %594 = vmatmul.mubr.msk.f32.vlgmr.msra.gmra.mrb[2].mxu1 %vm396_vm9, %v384_v37 }
 0x2c4   :  { %v466_v19 = vpop.f32.mrb[2].mxu1 }
 0x2c5   :  { %v467_v20 = vadd.f32 %v490_v15, %v466_v19  ;;  %v595_v21 = vpop.f32.mrb[3].mxu1 }
 0x2c7   :  { %471 = vst.msk [vmem:[%s821_s7] sm:$0xff] %vm470_vm10, %v467_v20 }

</bundles_post_ra>
